<compile_context>
chip_gen: v7x
topology: tpu7x:2x2x1
jax: 0.10.0
libtpu: 0.0.40
codegen_flags: <defaults>
</compile_context>

<pallas_src>
import numpy as np
import jax
import jax.numpy as jnp
from jax.experimental import pallas as pl
from jax.experimental.pallas import tpu as pltpu

N_STATE = 18


def _build_state_space() -> np.ndarray:
    """Deterministic constant state-space matrix from the module's __init__."""
    ss = np.zeros((N_STATE, N_STATE), dtype=np.float64)
    # rows 0..5 and 9..14 have a 1 at column row+3 (velocity -> position coupling)
    for i in list(range(0, 6)) + list(range(9, 15)):
        ss[i, i + 3] = 1.0
    return ss


def _build_propagator(dt, num_steps: int):
    """M such that x_next_rows = x_rows @ M reproduces `num_steps` RK4 updates.

    Exact: the reference holds x_dot fixed across RK stages, so one step is
    x @ (I + coeff*ss^T); ss^T is nilpotent ((ss^T)^3 == 0), so the k-step power
    has the closed binomial form below.
    """
    ss_t = _build_state_space().T                      # (N, N), exact 0/1
    ss_t2 = ss_t @ ss_t                                # (ss^T)^2, exact 0/1
    eye = np.eye(N_STATE, dtype=np.float64)
    coeff = dt * (6.0 + 3.0 * dt + dt * dt + dt * dt * dt / 4.0) / 6.0
    k = num_steps
    m = eye + (k * coeff) * ss_t + (k * (k - 1) / 2.0) * (coeff * coeff) * ss_t2
    return jnp.asarray(m, dtype=jnp.float32)           # works for static or traced dt


def _propagate_kernel(x_ref, m_ref, o_ref):
    # x_ref: (tile_rows, N) states, VMEM;  m_ref: (N, N) propagator, VMEM.
    o_ref[...] = jnp.dot(x_ref[...], m_ref[...], preferred_element_type=jnp.float32)


def dynamic_model_vehicle_forward(x, dt, num_steps: int = 1, tile_rows: int = 512):
    """x: (1, B, C, N) float32, dt: scalar.  Applies `num_steps` fused RK4 updates.

    num_steps=1 reproduces the PyTorch module's forward exactly (B == 1 case).
    All leading dims are flattened to independent state rows.
    """
    orig_shape = x.shape
    assert orig_shape[-1] == N_STATE
    rows = int(np.prod(orig_shape[:-1]))
    x2 = x.reshape(rows, N_STATE).astype(jnp.float32)
    m = _build_propagator(dt, num_steps)

    if rows <= tile_rows:
        # Single ~3 KB tile: plain no-grid call, whole arrays resident in VMEM.
        out = pl.pallas_call(
            _propagate_kernel,
            out_shape=jax.ShapeDtypeStruct((rows, N_STATE), jnp.float32),
            in_specs=[
                pl.BlockSpec(memory_space=pltpu.MemorySpace.VMEM),   # x (rows, N)
                pl.BlockSpec(memory_space=pltpu.MemorySpace.VMEM),   # M (N, N)
            ],
            out_specs=pl.BlockSpec(memory_space=pltpu.MemorySpace.VMEM),
        )(x2, m)
    else:
        # Batched path: tile the row axis, "parallel" so v7x shards over both TCs.
        tr = tile_rows
        assert tr % 8 == 0, "row tile must respect the (8, 128) sublane constraint"
        out = pl.pallas_call(
            _propagate_kernel,
            out_shape=jax.ShapeDtypeStruct((rows, N_STATE), jnp.float32),
            grid=(pl.cdiv(rows, tr),),
            in_specs=[
                pl.BlockSpec((tr, N_STATE), lambda i: (i, 0)),
                pl.BlockSpec((N_STATE, N_STATE), lambda i: (0, 0)),   # resident
            ],
            out_specs=pl.BlockSpec((tr, N_STATE), lambda i: (i, 0)),
            compiler_params=pltpu.CompilerParams(
                dimension_semantics=("parallel",)),
        )(x2, m)

    return out.reshape(orig_shape)


def _reference_forward(x, dt, ss):
    """Pure-JAX reference mirroring the PyTorch forward semantics (one step)."""
    one, b, c, n = x.shape
    x_sq = x.reshape(c, n)
    x_dot = jnp.matmul(jnp.asarray(ss, jnp.float32), x_sq.T)     # (N, C)
    dkd1 = x_dot
    dkd2 = x_dot + dkd1 * (dt / 2)
    dkd3 = x_dot + dkd2 * (dt / 2)
    dkd4 = x_dot + dkd3 * dt
    dk_total = (dkd1 + 2 * dkd2 + 2 * dkd3 + dkd4) / 6
    dk_total = dk_total.reshape(1, 1, n, c).transpose(0, 1, 3, 2)
    return x + dk_total * dt


if __name__ == "__main__":
    key = jax.random.PRNGKey(0)
    k_small, k_big = jax.random.split(key)

    C = 37          # 2 * 18 + 1 UKF sigma points
    dt = 0.01
    ss = _build_state_space()

    x = jax.random.normal(k_small, (1, 1, C, N_STATE), dtype=jnp.float32)

    # --- single RK4 step: matches the PyTorch module's forward ---------------
    out = jax.block_until_ready(dynamic_model_vehicle_forward(x, dt))
    ref = _reference_forward(x, dt, ss)
    np.testing.assert_allclose(np.asarray(out), np.asarray(ref),
                               rtol=2e-5, atol=2e-5)

    # --- fused multi-step: one matmul with the nilpotent propagator ----------
    steps = 8
    out_multi = jax.block_until_ready(
        dynamic_model_vehicle_forward(x, dt, num_steps=steps))
    ref_multi = x
    for _ in range(steps):
        ref_multi = _reference_forward(ref_multi, dt, ss)
    np.testing.assert_allclose(np.asarray(out_multi), np.asarray(ref_multi),
                               rtol=2e-5, atol=2e-5)

    # --- batched sigma-point sets: tiled grid path, "parallel" row axis ------
    C_big = 1024
    x_big = jax.random.normal(k_big, (1, 1, C_big, N_STATE), dtype=jnp.float32)
    out_big = jax.block_until_ready(
        dynamic_model_vehicle_forward(x_big, dt, tile_rows=256))
    ref_big = _reference_forward(x_big, dt, ss)
    np.testing.assert_allclose(np.asarray(out_big), np.asarray(ref_big),
                               rtol=2e-5, atol=2e-5)

    print("KERNEL_OK")
</pallas_src>

<mosaic_0001>
module attributes {stable_mosaic.version = 11 : i64} {
  func.func @_propagate_kernel(%arg0: memref<37x18xf32, #tpu.memory_space<vmem>>, %arg1: memref<18x18xf32, #tpu.memory_space<vmem>>, %arg2: memref<37x18xf32, #tpu.memory_space<vmem>>) attributes {dimension_semantics = [], scalar_prefetch = 0 : i64, scratch_operands = 0 : i64, tpu.core_type = #tpu.core_type<tc>} {
    %c0 = arith.constant 0 : index
    %c0_0 = arith.constant 0 : index
    %0 = vector.load %arg0[%c0, %c0_0] : memref<37x18xf32, #tpu.memory_space<vmem>>, vector<37x18xf32>
    %c0_1 = arith.constant 0 : index
    %c0_2 = arith.constant 0 : index
    %1 = vector.load %arg1[%c0_1, %c0_2] : memref<18x18xf32, #tpu.memory_space<vmem>>, vector<18x18xf32>
    %cst = arith.constant dense<0.000000e+00> : vector<37x18xf32>
    %2 = tpu.matmul %0, %1, %cst {dimension_numbers = #tpu.dot_dimension_numbers<[1], [0], [0], [1], [0, 0, 1, 1], [], []>} : vector<37x18xf32>, vector<18x18xf32>, vector<37x18xf32> -> vector<37x18xf32>
    %c0_3 = arith.constant 0 : index
    %c0_4 = arith.constant 0 : index
    %3 = vector.load %arg2[%c0_3, %c0_4] : memref<37x18xf32, #tpu.memory_space<vmem>>, vector<37x18xf32>
    tpu.vector_store %arg2[%c0_3, %c0_4], %2 {strides = array<i32>} : memref<37x18xf32, #tpu.memory_space<vmem>>, vector<37x18xf32>,
    return
  }
}

</mosaic_0001>

<bundles_post_ra>
// kernel: tpu_custom_call.1
= control target key start
LH: loop header
LB: loop body
LE: loop exit
PB: predicated region body
PF: predicated region fallthrough
CT: control target
= control target key end

     0   :  { %v184_v0 = vmov 0.0|0.0   ;;  %vm185_vm0 = vmmov 0   ;;  %v186_v4 = vmov 0.0   ;;  %vm35_vm1 = vcmask 1041408   ;;  %s255_s1 = inlined_call_operand.vmem [shape: f32[18,18], index: 1, kind: input, shape index: {}]   ;;  %s256_s0 = inlined_call_operand.vmem [shape: f32[37,18], index: 0, kind: input, shape index: {}]   ;;  %s257_s2 = inlined_call_operand.vmem [shape: f32[37,18], index: 2, kind: output, shape index: {}]  }
   0x1   :  { %174 = vmatprep.subr.bf16.mxu0 %v184_v0  ;;  %v16_v1 = vld [vmem:[%s255_s1] sm:$0xff]  ;;  %v17_v2 = vld [vmem:[%s255_s1 + $0x8] sm:$0xff]  ;;  %177 = vmatprep.subr.bf16.mxu1 %v184_v0  ;;  %v18_v5 = vld [vmem:[%s255_s1 + $0x10] sm:$0x3]  ;;  %vm19_vm2 = vcmask 146432   ;;  %vm133_vm3 = vcmask 143360  }
   0x2   :  { %v175_v3 = vpack.c.bf16 %v17_v2, %v16_v1  ;;  %159 = vmatprep.mubr.msk.f32.mxu0 %vm185_vm0, %v186_v4  ;;  %168 = vmatprep.mubr.msk.f32.mxu1 %vm185_vm0, %v186_v4  ;;  %v11_v6 = vld [vmem:[%s256_s0] sm:$0xff]  ;;  %v14_v7 = vld [vmem:[%s256_s0 + $0x18] sm:$0xff]  ;;  %v12_v8 = vld [vmem:[%s256_s0 + $0x8] sm:$0xff] }
   0x3   :  { %v15_v9 = vld [vmem:[%s256_s0 + $0x20] sm:$0x1f]  ;;  %v13_v10 = vld [vmem:[%s256_s0 + $0x10] sm:$0xff] }
   0x4   :  { %176 = vmatpush3.bf16.msra.mxu0 %v175_v3  ;;  %179 = vmatpush3.bf16.msra.mxu1 %v175_v3 }
   0x5   :  { %157 = vmatprep.subr.mxu0 %v186_v4  ;;  %178 = vmatprep.subr.mxu1 %v186_v4 }
   0x8   :  { %158 = vmatpush3.msk.msra.mxu0 %vm35_vm1, %v18_v5  ;;  %180 = vmatpush3.msk.msra.mxu1 %vm35_vm1, %v18_v5 }
   0x9   :  { %160 = vmatmul.mubr.msk.f32.vlgmr.msra.gmra.mrb[0].mxu0 %vm19_vm2, %v11_v6  ;;  %169 = vmatmul.mubr.msk.f32.vlgmr.msra.gmra.mrb[0].mxu1 %vm19_vm2, %v14_v7 }
   0xa   :  { %162 = vmatprep.mubr.msk.f32.mxu0 %vm185_vm0, %v186_v4  ;;  %171 = vmatprep.mubr.msk.f32.mxu1 %vm185_vm0, %v186_v4 }
   0xd   :  { %163 = vmatmul.mubr.msk.f32.gmra.mrb[2].mxu0 %vm19_vm2, %v12_v8  ;;  %172 = vmatmul.mubr.msk.f32.gmra.mrb[2].mxu1 %vm19_vm2, %v15_v9 }
   0xe   :  { %165 = vmatprep.mubr.msk.f32.mxu0 %vm185_vm0, %v186_v4 }
  0x11   :  { %166 = vmatmul.mubr.msk.f32.gmra.mrb[4].mxu0 %vm19_vm2, %v13_v10 }
  0xdc   :  { %v105_v11 = vpop.f32.mrb[0].mxu0  ;;  %v120_v12 = vpop.f32.mrb[0].mxu1 }
  0xdd   :  { %129 = vst.msk [vmem:[%s257_s2] sm:$0xff] %vm19_vm2, %v105_v11  ;;  %v161_v13 = vpop.f32.mrb[1].mxu0  ;;  %132 = vst.msk [vmem:[%s257_s2 + $0x18] sm:$0xff] %vm19_vm2, %v120_v12  ;;  %v170_v14 = vpop.f32.mrb[1].mxu1 }
  0xe0   :  { %v110_v15 = vpop.f32.mrb[2].mxu0  ;;  %v125_v16 = vpop.f32.mrb[2].mxu1 }
  0xe1   :  { %130 = vst.msk [vmem:[%s257_s2 + $0x8] sm:$0xff] %vm19_vm2, %v110_v15  ;;  %v164_v17 = vpop.f32.mrb[3].mxu0  ;;  %v173_v18 = vpop.f32.mrb[3].mxu1 }
  0xe2   :  { %134 = vst.msk [vmem:[%s257_s2 + $0x20] sm:$0x1f] %vm133_vm3, %v125_v16 }
  0xe4   :  { %v115_v19 = vpop.f32.mrb[4].mxu0 }
  0xe5   :  { %131 = vst.msk [vmem:[%s257_s2 + $0x10] sm:$0xff] %vm19_vm2, %v115_v19  ;;  %v167_v20 = vpop.f32.mrb[5].mxu0 }

</bundles_post_ra>
